<compile_context>
chip_gen: v6e
topology: v6e:2x2x1
jax: 0.10.0
libtpu: 0.0.40
codegen_flags: <defaults>
</compile_context>

<pallas_src>
import functools

import jax
import jax.numpy as jnp
from jax.experimental import pallas as pl
from jax.experimental.pallas import tpu as pltpu


_LANE = 128
_SUBLANE = 8
_NEG_FILL = -1e9                        # exp((-1e9)/T - max) underflows to 0
_TILE_BYTES_BUDGET = 6 * 1024 * 1024    # per single input block (x2 inputs x2 bufs)
_MAX_BLOCK_B = 4096
_VMEM_LIMIT_BYTES = 40 * 1024 * 1024    # < v7x 64 MiB physical, > default scoped limits


def _round_up(x, m):
    return (x + m - 1) // m * m


def _distill_kl_kernel(ys_ref, yt_ref, row_kl_ref, *, inv_t):
    # Upcast in VMEM; inputs may be bf16 to halve HBM traffic.
    ys = ys_ref[...].astype(jnp.float32) * inv_t
    yt = yt_ref[...].astype(jnp.float32) * inv_t

    # log_softmax of student logits along the class (lane) axis.
    ys_shift = ys - jnp.max(ys, axis=-1, keepdims=True)
    log_z_s = jnp.log(jnp.sum(jnp.exp(ys_shift), axis=-1, keepdims=True))
    log_p_s = ys_shift - log_z_s

    # softmax / log_softmax pieces of teacher logits.
    yt_shift = yt - jnp.max(yt, axis=-1, keepdims=True)
    e_t = jnp.exp(yt_shift)
    z_t = jnp.sum(e_t, axis=-1, keepdims=True)
    log_p_t = yt_shift - jnp.log(z_t)

    # Row KL = (1/z_t) * sum_c e_t * (log_p_t - log_p_s): a single divide per
    # row instead of materializing p_t = e_t / z_t over the whole tile.
    num = jnp.sum(e_t * (log_p_t - log_p_s), axis=-1, keepdims=True)
    # approx=False: the ~2^-12 error of the approx reciprocal would be amplified
    # by small KL values; the exact per-row divide is only block_b scalars.
    row_kl_ref[...] = num * pl.reciprocal(z_t, approx=False)


def distill_kl(y_s, y_t, temperature, block_b=None):
    """DistillKL loss (scalar f32) via a Pallas TPU kernel."""
    assert y_s.shape == y_t.shape and y_s.ndim == 2
    B, C = y_s.shape

    # Lane-dense class axis: pad to a multiple of 128 with a large negative so
    # the padded classes get exactly zero probability mass.
    Cp = _round_up(C, _LANE)
    if Cp != C:
        pad_c = [(0, 0), (0, Cp - C)]
        y_s = jnp.pad(y_s, pad_c, constant_values=_NEG_FILL)
        y_t = jnp.pad(y_t, pad_c, constant_values=_NEG_FILL)

    # Largest batch tile whose double-buffered inputs stay inside a
    # conservative VMEM budget (safe across v5e/v6e/v7x with the raised limit).
    if block_b is None:
        itemsize = max(jnp.dtype(y_s.dtype).itemsize, jnp.dtype(y_t.dtype).itemsize)
        per_row_bytes = Cp * itemsize
        fit_rows = max(_SUBLANE,
                       (_TILE_BYTES_BUDGET // per_row_bytes) // _SUBLANE * _SUBLANE)
        block_b = min(fit_rows, _MAX_BLOCK_B, _round_up(B, _SUBLANE))
    block_b = max(_SUBLANE, _round_up(int(block_b), _SUBLANE))

    # Pad the batch with zero rows: identical student/teacher rows have KL 0,
    # so they contribute nothing to the final sum.
    Bp = _round_up(B, block_b)
    if Bp != B:
        pad_b = [(0, Bp - B), (0, 0)]
        y_s = jnp.pad(y_s, pad_b, constant_values=0.0)
        y_t = jnp.pad(y_t, pad_b, constant_values=0.0)

    kernel = functools.partial(_distill_kl_kernel, inv_t=1.0 / float(temperature))

    row_kl = pl.pallas_call(
        kernel,
        out_shape=jax.ShapeDtypeStruct((Bp, 1), jnp.float32),
        grid_spec=pltpu.PrefetchScalarGridSpec(
            num_scalar_prefetch=0,
            grid=(Bp // block_b,),
            in_specs=[
                pl.BlockSpec((block_b, Cp), lambda i: (i, 0)),
                pl.BlockSpec((block_b, Cp), lambda i: (i, 0)),
            ],
            out_specs=pl.BlockSpec((block_b, 1), lambda i: (i, 0)),
        ),
        compiler_params=pltpu.CompilerParams(
            dimension_semantics=("parallel",),
            vmem_limit_bytes=_VMEM_LIMIT_BYTES,
        ),
    )(y_s, y_t)

    # batchmean over the TRUE batch size + T^2 scaling, hoisted out of the kernel.
    scale = (float(temperature) ** 2) / float(B)
    return jnp.sum(row_kl) * scale


def _reference_distill_kl(y_s, y_t, temperature):
    ys = y_s.astype(jnp.float32) / temperature
    yt = y_t.astype(jnp.float32) / temperature
    log_p_s = jax.nn.log_softmax(ys, axis=1)
    p_t = jax.nn.softmax(yt, axis=1)
    log_p_t = jax.nn.log_softmax(yt, axis=1)
    kl = jnp.sum(p_t * (log_p_t - log_p_s))
    return kl / y_s.shape[0] * temperature ** 2


if __name__ == "__main__":
    T = 4.0  # distillation temperature (module __init__ arg)

    # Case 1: small f32 logits [batch, num_classes], matching the module spec.
    B, C = 16, 32
    k_s, k_t = jax.random.split(jax.random.PRNGKey(0))
    y_s = jax.random.normal(k_s, (B, C), dtype=jnp.float32)
    y_t = jax.random.normal(k_t, (B, C), dtype=jnp.float32)
    loss = jax.block_until_ready(distill_kl(y_s, y_t, T))
    ref = _reference_distill_kl(y_s, y_t, T)
    assert jnp.allclose(loss, ref, rtol=1e-5, atol=1e-6), (loss, ref)

    # Case 2: ragged shapes (class- and batch-padding paths) with bf16 inputs
    # (half the HBM bytes; math still f32 in VMEM).
    B2, C2 = 10, 200
    k_s2, k_t2 = jax.random.split(jax.random.PRNGKey(1))
    y_s2 = jax.random.normal(k_s2, (B2, C2), dtype=jnp.float32).astype(jnp.bfloat16)
    y_t2 = jax.random.normal(k_t2, (B2, C2), dtype=jnp.float32).astype(jnp.bfloat16)
    loss2 = jax.block_until_ready(distill_kl(y_s2, y_t2, T))
    ref2 = _reference_distill_kl(y_s2, y_t2, T)
    assert jnp.allclose(loss2, ref2, rtol=1e-4, atol=1e-6), (loss2, ref2)

    print("KERNEL_OK")
</pallas_src>

<mosaic_0001>
module attributes {stable_mosaic.version = 11 : i64} {
  func.func @_distill_kl_kernel(%arg0: i32, %arg1: memref<16x128xf32, #tpu.memory_space<vmem>>, %arg2: memref<16x128xf32, #tpu.memory_space<vmem>>, %arg3: memref<16x1xf32, #tpu.memory_space<vmem>>) attributes {dimension_semantics = [#tpu.dimension_semantics<parallel>], iteration_bounds = array<i64: 1>, scalar_prefetch = 0 : i64, scratch_operands = 0 : i64, tpu.core_type = #tpu.core_type<tc>, window_params = [{transform_indices = @transform_0, window_bounds = array<i64: 16, 128>}, {transform_indices = @transform_1, window_bounds = array<i64: 16, 128>}, {transform_indices = @transform_2, window_bounds = array<i64: 16, 1>}]} {
    %c0 = arith.constant 0 : index
    %c0_0 = arith.constant 0 : index
    %0 = vector.load %arg1[%c0, %c0_0] : memref<16x128xf32, #tpu.memory_space<vmem>>, vector<16x128xf32>
    %cst = arith.constant 2.500000e-01 : f32
    %1 = vector.broadcast %cst : f32 to vector<16x128xf32>
    %2 = arith.mulf %0, %1 : vector<16x128xf32>
    %c0_1 = arith.constant 0 : index
    %c0_2 = arith.constant 0 : index
    %3 = vector.load %arg2[%c0_1, %c0_2] : memref<16x128xf32, #tpu.memory_space<vmem>>, vector<16x128xf32>
    %cst_3 = arith.constant 2.500000e-01 : f32
    %4 = vector.broadcast %cst_3 : f32 to vector<16x128xf32>
    %5 = arith.mulf %3, %4 : vector<16x128xf32>
    %cst_4 = arith.constant dense<0xFF800000> : vector<16xf32>
    %6 = vector.multi_reduction <maximumf>, %2, %cst_4 [1] : vector<16x128xf32> to vector<16xf32>
    %7 = vector.shape_cast %6 : vector<16xf32> to vector<16x1xf32>
    %8 = vector.broadcast %7 : vector<16x1xf32> to vector<16x128xf32>
    %9 = arith.subf %2, %8 : vector<16x128xf32>
    %10 = math.exp %9 : vector<16x128xf32>
    %cst_5 = arith.constant dense<0.000000e+00> : vector<16xf32>
    %11 = vector.multi_reduction <add>, %10, %cst_5 [1] : vector<16x128xf32> to vector<16xf32>
    %12 = vector.shape_cast %11 : vector<16xf32> to vector<16x1xf32>
    %13 = math.log %12 : vector<16x1xf32>
    %14 = vector.broadcast %13 : vector<16x1xf32> to vector<16x128xf32>
    %15 = arith.subf %9, %14 : vector<16x128xf32>
    %cst_6 = arith.constant dense<0xFF800000> : vector<16xf32>
    %16 = vector.multi_reduction <maximumf>, %5, %cst_6 [1] : vector<16x128xf32> to vector<16xf32>
    %17 = vector.shape_cast %16 : vector<16xf32> to vector<16x1xf32>
    %18 = vector.broadcast %17 : vector<16x1xf32> to vector<16x128xf32>
    %19 = arith.subf %5, %18 : vector<16x128xf32>
    %20 = math.exp %19 : vector<16x128xf32>
    %cst_7 = arith.constant dense<0.000000e+00> : vector<16xf32>
    %21 = vector.multi_reduction <add>, %20, %cst_7 [1] : vector<16x128xf32> to vector<16xf32>
    %22 = vector.shape_cast %21 : vector<16xf32> to vector<16x1xf32>
    %23 = math.log %22 : vector<16x1xf32>
    %24 = vector.broadcast %23 : vector<16x1xf32> to vector<16x128xf32>
    %25 = arith.subf %19, %24 : vector<16x128xf32>
    %26 = arith.subf %25, %15 : vector<16x128xf32>
    %27 = arith.mulf %20, %26 : vector<16x128xf32>
    %cst_8 = arith.constant dense<0.000000e+00> : vector<16xf32>
    %28 = vector.multi_reduction <add>, %27, %cst_8 [1] : vector<16x128xf32> to vector<16xf32>
    %29 = vector.shape_cast %28 : vector<16xf32> to vector<16x1xf32>
    %30 = tpu.reciprocal %22 : vector<16x1xf32> -> vector<16x1xf32>
    %31 = arith.mulf %29, %30 : vector<16x1xf32>
    %c0_9 = arith.constant 0 : index
    %c0_10 = arith.constant 0 : index
    %32 = vector.load %arg3[%c0_9, %c0_10] : memref<16x1xf32, #tpu.memory_space<vmem>>, vector<16x1xf32>
    tpu.vector_store %arg3[%c0_9, %c0_10], %31 {strides = array<i32>} : memref<16x1xf32, #tpu.memory_space<vmem>>, vector<16x1xf32>,
    return
  }
  func.func @transform_0(%arg0: i32) -> (i32, i32) {
    %c0_i32 = arith.constant 0 : i32
    %c0_i32_0 = arith.constant 0 : i32
    return %arg0, %c0_i32 : i32, i32
  }
  func.func @transform_1(%arg0: i32) -> (i32, i32) {
    %c0_i32 = arith.constant 0 : i32
    %c0_i32_0 = arith.constant 0 : i32
    return %arg0, %c0_i32 : i32, i32
  }
  func.func @transform_2(%arg0: i32) -> (i32, i32) {
    %c0_i32 = arith.constant 0 : i32
    %c0_i32_0 = arith.constant 0 : i32
    return %arg0, %c0_i32 : i32, i32
  }
}

</mosaic_0001>

<bundles_post_ra>
// kernel: tpu_custom_call.1
= control target key start
LH: loop header
LB: loop body
LE: loop exit
PB: predicated region body
PF: predicated region fallthrough
CT: control target
= control target key end

     0   :  { %7 = vsyncpa [#allocation3], 0  ;;  %s207_s0 = inlined_call_operand.hbm [shape: f32[16,128], index: 0, kind: input, shape index: {}]   ;;  %s208_s1 = inlined_call_operand.hbm [shape: f32[16,128], index: 1, kind: input, shape index: {}]   ;;  %s209_s2 = inlined_call_operand.vmem [shape: f32[16,1], index: 2, kind: output, shape index: {}]  }
   0x1   :  { %8 = vsyncpa [#allocation5], 0  ;;  %s176_s9 = smov [#allocation2]  }
   0x2   :  { %s14_s10 = sshll.u32 %s176_s9, 4  ;;  %s15_s10 = int_to_ptr.vmem [resolvable:$true] %s14_s10 }
   0x3   :  { %s140_s11 = scalar_lea.vmem %s15_s10, 256  ;;  %p145_p1 = scmp.lt.s32.totalorder %s15_s10, %s15_s10 }
   0x4   :  { %p141_p0 = scmp.ne.s32.totalorder %s15_s10, %s140_s11  ;;  %p146_p2 = scmp.lt.s32.totalorder %s140_s11, %s140_s11 }
   0x6   :  { %p147_p3 = por %p146_p2, %p145_p1 }
   0x8   :  { %p148_p4 = pnand %p147_p3, %p141_p0 }
   0xa   :  { %151 = shalt.err (!%p148_p4)
}
   0xb   :  { %s177_s12 = smov 128   ;;  %s178_s13 = smov 8  }
   0xc   :  { %20 = dma.hbm_to_vmem [thread:$0]  %s207_s0, 256, %s15_s10, [#allocation3], %s177_s12, %s177_s12, %s178_s13  }
   0xd   :  { %s179_s16 = smov [#allocation4]  }
   0xe   :  { %s26_s17 = sshll.u32 %s179_s16, 4  ;;  %s27_s17 = int_to_ptr.vmem [resolvable:$true] %s26_s17 }
   0xf   :  { %s160_s18 = scalar_lea.vmem %s27_s17, 256  ;;  %p165_p6 = scmp.lt.s32.totalorder %s27_s17, %s27_s17 }
  0x10   :  { %p161_p5 = scmp.ne.s32.totalorder %s27_s17, %s160_s18  ;;  %p166_p7 = scmp.lt.s32.totalorder %s160_s18, %s160_s18 }
  0x12   :  { %p167_p8 = por %p166_p7, %p165_p6 }
  0x14   :  { %p168_p9 = pnand %p167_p8, %p161_p5 }
  0x16   :  { %171 = shalt.err (!%p168_p9)
}
  0x17   :  { %32 = dma.hbm_to_vmem [thread:$0]  %s208_s1, 256, %s27_s17, [#allocation5], %s177_s12, %s177_s12, %s178_s13  }
  0x18   :  { %172 = dma.done.wait [#allocation3], 256  }
  0x19   :  { %173 = vsyncadd [#allocation3], 4294967040 }
  0x1a   :  { %174 = dma.done.wait [#allocation5], 256  }
  0x1b   :  { %175 = vsyncadd [#allocation5], 4294967040  ;;  %v39_v0 = vld [vmem:[#allocation2] sm:$0xff]  ;;  %v43_v1 = vld [vmem:[#allocation4] sm:$0xff]  ;;  %vm99_vm0 = vcmask 7168  }
  0x1c   :  { %v40_v2 = vld [vmem:[#allocation2 + $0x8] sm:$0xff]  ;;  %v41_v3 = vmul.f32 0.25, %v39_v0  ;;  %v45_v4 = vmul.f32 0.25, %v43_v1  ;;  %v44_v5 = vld [vmem:[#allocation4 + $0x8] sm:$0xff] }
  0x1d   :  { %v42_v6 = vmul.f32 0.25, %v40_v2  ;;  %v46_v7 = vmul.f32 0.25, %v44_v5 }
  0x1e   :  { %47 = vmax.xlane.f32.xlu0 %v41_v3  ;;  %67 = vmax.xlane.f32.xlu1 %v45_v4 }
  0x22   :  { %49 = vmax.xlane.f32.xlu0 %v42_v6  ;;  %69 = vmax.xlane.f32.xlu1 %v46_v7 }
  0xa7   :  { %v48_v8 = vpop.xlane.xlu0 %47  ;;  %v68_v9 = vpop.xlane.xlu1 %67 }
  0xa8   :  { %v51_v10 = vsub.f32 %v41_v3, %v48_v8  ;;  %v71_v11 = vsub.f32 %v45_v4, %v68_v9 }
  0xaa   :  { %v53_v12 = vmul.f32 1.442695, %v51_v10  ;;  %v73_v13 = vmul.f32 1.442695, %v71_v11 }
  0xab   :  { %v50_v14 = vpop.xlane.xlu0 %49  ;;  %v70_v15 = vpop.xlane.xlu1 %69 }
  0xac   :  { %112 = vpow2.f32 %v53_v12  ;;  %v52_v16 = vsub.f32 %v42_v6, %v50_v14  ;;  %v72_v17 = vsub.f32 %v46_v7, %v70_v15 }
  0xad   :  { %114 = vpow2.f32 %v73_v13 }
  0xae   :  { %v55_v18 = vmul.f32 1.442695, %v52_v16  ;;  %v75_v19 = vmul.f32 1.442695, %v72_v17 }
  0xb0   :  { %116 = vpow2.f32 %v55_v18 }
  0xb1   :  { %118 = vpow2.f32 %v75_v19 }
  0xb9   :  { %v113_v20 = vpop.eup %112 }
  0xba   :  { %57 = vadd.xlane.f32.xlu0 %v113_v20  ;;  %v115_v21 = vpop.eup %114 }
  0xbd   :  { %v117_v22 = vpop.eup %116 }
  0xbe   :  { %77 = vadd.xlane.f32.xlu0 %v115_v21  ;;  %59 = vadd.xlane.f32.xlu1 %v117_v22  ;;  %v119_v23 = vpop.eup %118 }
  0xc2   :  { %79 = vadd.xlane.f32.xlu1 %v119_v23 }
 0x143   :  { %v58_v24 = vpop.xlane.xlu0 %57 }
 0x144   :  { %120 = vlog2.f32 %v58_v24 }
 0x147   :  { %v60_v25 = vpop.xlane.xlu1 %59  ;;  %v78_v26 = vpop.xlane.xlu0 %77 }
 0x148   :  { %122 = vlog2.f32 %v60_v25 }
 0x149   :  { %124 = vlog2.f32 %v78_v26 }
 0x14b   :  { %v80_v27 = vpop.xlane.xlu1 %79 }
 0x14c   :  { %126 = vlog2.f32 %v80_v27 }
 0x14d   :  { %128 = vrcp.f32 %v78_v26 }
 0x14e   :  { %130 = vrcp.f32 %v80_v27 }
 0x151   :  { %v121_v28 = vpop.eup %120 }
 0x152   :  { %v62_v30 = vmul.f32 0.6931472, %v121_v28 }
 0x154   :  { %v65_v35 = vsub.f32 %v51_v10, %v62_v30 }
 0x155   :  { %v123_v29 = vpop.eup %122 }
 0x156   :  { %v125_v31 = vpop.eup %124  ;;  %v64_v33 = vmul.f32 0.6931472, %v123_v29 }
 0x157   :  { %v82_v32 = vmul.f32 0.6931472, %v125_v31 }
 0x158   :  { %v66_v39 = vsub.f32 %v52_v16, %v64_v33 }
 0x159   :  { %v127_v34 = vpop.eup %126  ;;  %v85_v36 = vsub.f32 %v71_v11, %v82_v32 }
 0x15a   :  { %v84_v37 = vmul.f32 0.6931472, %v127_v34  ;;  %v129_v44 = vpop.eup %128 }
 0x15b   :  { %v87_v38 = vsub.f32 %v85_v36, %v65_v35  ;;  %v131_v47 = vpop.eup %130 }
 0x15c   :  { %v86_v40 = vsub.f32 %v72_v17, %v84_v37 }
 0x15d   :  { %v89_v41 = vmul.f32 %v115_v21, %v87_v38 }
 0x15e   :  { %v88_v42 = vsub.f32 %v86_v40, %v66_v39 }
 0x15f   :  { %91 = vadd.xlane.f32.xlu0 %v89_v41 }
 0x160   :  { %v90_v43 = vmul.f32 %v119_v23, %v88_v42 }
 0x162   :  { %93 = vadd.xlane.f32.xlu1 %v90_v43 }
 0x1e8   :  { %v92_v45 = vpop.xlane.xlu0 %91 }
 0x1e9   :  { %v97_v46 = vmul.f32 %v129_v44, %v92_v45 }
 0x1eb   :  { %100 = vst.msk [vmem:[%s209_s2] sm:$0xff] %vm99_vm0, %v97_v46  ;;  %v94_v48 = vpop.xlane.xlu1 %93 }
 0x1ec   :  { %v98_v49 = vmul.f32 %v131_v47, %v94_v48 }
 0x1ee   :  { %101 = vst.msk [vmem:[%s209_s2 + $0x8] sm:$0xff] %vm99_vm0, %v98_v49 }
 0x1ef   :  { %106 = vsyncpa [#allocation3], 1 }
 0x1f0   :  { %107 = vsyncpa [#allocation5], 1 }

</bundles_post_ra>
